<compile_context>
chip_gen: v5e
topology: v5e:2x2
jax: 0.10.0
libtpu: 0.0.40
codegen_flags: <defaults>
</compile_context>

<pallas_src>
import math
import functools

import jax
import jax.numpy as jnp
from jax import lax
from jax.experimental import pallas as pl
from jax.experimental.pallas import tpu as pltpu


def _cross_attn_kernel(q_ref, ctx_ref,
                       wq_ref, wkv_ref, wo_ref,   # (E,E), (E,2E), (E,E): pre-transposed, x @ W
                       par_ref,                   # (8, 2E) f32: bq*s | [bk,bv] | bo | gamma | beta
                       o_ref,
                       o_scratch,                 # (TB, Lq, E) f32 VMEM: per-head output slab
                       *, num_heads, head_dim, ln_eps, approx_recip):
    f32 = jnp.float32
    cdt = wq_ref.dtype                            # MXU compute dtype (bf16 or f32)
    tb, lq, emb = q_ref.shape
    lk = ctx_ref.shape[1]
    m_q = tb * lq
    m_k = tb * lk

    bq = par_ref[0:1, 0:emb]                      # (1, E), 1/sqrt(dh) already folded in
    bkv = par_ref[1:2, :]                         # (1, 2E)
    bo = par_ref[2:3, 0:emb]
    gamma = par_ref[3:4, 0:emb]
    beta = par_ref[4:5, 0:emb]

    # Batch-folded in-projections: M = TB*Lq (or TB*Lk), K = E -> full MXU depth.
    q2 = q_ref[...].reshape(m_q, emb).astype(cdt)
    c2 = ctx_ref[...].reshape(m_k, emb).astype(cdt)
    q = (jnp.dot(q2, wq_ref[...], preferred_element_type=f32) + bq).astype(cdt)     # (M, E)
    kv = (jnp.dot(c2, wkv_ref[...], preferred_element_type=f32) + bkv).astype(cdt)  # (M, 2E)

    q3 = q.reshape(tb, lq, emb)
    kv3 = kv.reshape(tb, lk, 2 * emb)

    # Per-(batch, head) attention.  Head outputs go into o_scratch so the output
    # projection below is a single full-depth matmul against the whole Wo.
    # (Static loop: fine for small head counts; switch to lax.fori_loop(unroll=2..4)
    #  with pl.ds slices for num_heads >= 8.)
    qk_dims = (((1,), (1,)), ((), ()))            # contract last dims -> (Lq, Lk), no transpose
    for b in range(tb):
        for h in range(num_heads):
            lo = h * head_dim
            qh = q3[b, :, lo:lo + head_dim]                       # (Lq, dh)
            kh = kv3[b, :, lo:lo + head_dim]                      # (Lk, dh)
            vh = kv3[b, :, emb + lo:emb + lo + head_dim]          # (Lk, dh)
            s = lax.dot_general(qh, kh, qk_dims, preferred_element_type=f32)  # (Lq, Lk)
            s = s - jnp.max(s, axis=-1, keepdims=True)
            p = jnp.exp(s)
            denom = jnp.sum(p, axis=-1, keepdims=True)
            p = p * pl.reciprocal(denom, approx=approx_recip)
            oh = jnp.dot(p.astype(cdt), vh, preferred_element_type=f32)       # (Lq, dh)
            o_scratch[b, :, lo:lo + head_dim] = oh

    # Single full-width output projection over the whole (M, E) slab.
    attn = jnp.dot(o_scratch[...].reshape(m_q, emb).astype(cdt), wo_ref[...],
                   preferred_element_type=f32) + bo

    # Residual (re-read the pipelined query block; no long-lived f32 copy) + LayerNorm
    # with centered variance for numerical safety.
    x = q_ref[...].reshape(m_q, emb).astype(f32) + attn
    inv_e = 1.0 / emb
    mean = jnp.sum(x, axis=-1, keepdims=True) * inv_e
    xc = x - mean
    var = jnp.sum(xc * xc, axis=-1, keepdims=True) * inv_e
    out = xc * lax.rsqrt(var + ln_eps) * gamma + beta
    o_ref[...] = out.reshape(tb, lq, emb).astype(o_ref.dtype)


def _pick_batch_tile(batch, lq, target_m=256):
    """Largest divisor of batch with TB*Lq <= target_m, keeping >=2 grid steps when B >= 2."""
    min_steps = 2 if batch >= 2 else 1
    best = 1
    for tb in range(1, batch + 1):
        if batch % tb == 0 and batch // tb >= min_steps and tb * lq <= target_m:
            best = tb
    return best


def cross_attention_block(query, context, params, *, num_heads, ln_eps=1e-5,
                          compute_dtype=jnp.bfloat16, batch_tile=None):
    """query: (B, Lq, E), context: (B, Lk, E).  Returns (B, Lq, E)."""
    B, Lq, E = query.shape
    _, Lk, _ = context.shape
    assert E % num_heads == 0
    head_dim = E // num_heads
    scale = 1.0 / math.sqrt(head_dim)

    if batch_tile is None:
        batch_tile = _pick_batch_tile(B, Lq)
    assert B % batch_tile == 0
    grid_b = B // batch_tile

    # Host-side weight prep: transpose so the kernel does x @ W (E on the lane axis),
    # fold the score scale into the Q projection, fuse K|V into one (E, 2E) weight.
    wq_t = (params["wq"].T * scale).astype(compute_dtype)                                    # (E, E)
    wkv_t = jnp.concatenate([params["wk"].T, params["wv"].T], axis=1).astype(compute_dtype)  # (E, 2E)
    wo_t = params["wo"].T.astype(compute_dtype)                                              # (E, E)

    # Pack all small vectors into one lane-dense (8, 2E) f32 tile (single resident buffer).
    pparams = jnp.zeros((8, 2 * E), jnp.float32)
    pparams = pparams.at[0, :E].set(params["bq"].astype(jnp.float32) * scale)
    pparams = pparams.at[1, :E].set(params["bk"].astype(jnp.float32))
    pparams = pparams.at[1, E:].set(params["bv"].astype(jnp.float32))
    pparams = pparams.at[2, :E].set(params["bo"].astype(jnp.float32))
    pparams = pparams.at[3, :E].set(params["gamma"].astype(jnp.float32))
    pparams = pparams.at[4, :E].set(params["beta"].astype(jnp.float32))

    kernel = functools.partial(
        _cross_attn_kernel,
        num_heads=num_heads, head_dim=head_dim, ln_eps=ln_eps,
        approx_recip=(jnp.dtype(compute_dtype) != jnp.dtype(jnp.float32)))

    cbytes = jnp.dtype(compute_dtype).itemsize
    ibytes = jnp.dtype(query.dtype).itemsize

    # VMEM budget: double-buffered I/O blocks + resident weights/params + scratch +
    # in-kernel temporaries, with ~2x headroom, clamped to 64 MiB (safe on v5e/v6e/v7x).
    block_io = 2 * (batch_tile * (Lq + Lk) * E * ibytes + batch_tile * Lq * E * ibytes)
    weights = 2 * (4 * E * E * cbytes + 8 * 2 * E * 4)
    scratch = batch_tile * Lq * E * 4
    work = batch_tile * ((Lq + Lk) * E * (4 + cbytes) + 2 * Lq * Lk * 4 + 2 * Lq * E * 4)
    vmem_limit = int(min(64 * 1024 * 1024,
                         max(4 * 1024 * 1024, 2 * (block_io + weights + scratch + work))))

    flops = 2 * B * (Lq * E * E                       # Q projection
                     + Lk * E * (2 * E)               # fused K|V projection
                     + 2 * num_heads * Lq * Lk * head_dim   # scores + PV
                     + Lq * E * E)                    # output projection
    cost = pl.CostEstimate(
        flops=flops,
        transcendentals=B * num_heads * Lq * Lk,
        bytes_accessed=(2 * query.size + context.size) * ibytes + 4 * E * E * cbytes)

    return pl.pallas_call(
        kernel,
        out_shape=jax.ShapeDtypeStruct((B, Lq, E), query.dtype),
        grid_spec=pltpu.PrefetchScalarGridSpec(
            num_scalar_prefetch=0,
            grid=(grid_b,),
            in_specs=[
                pl.BlockSpec((batch_tile, Lq, E), lambda i: (i, 0, 0)),   # query
                pl.BlockSpec((batch_tile, Lk, E), lambda i: (i, 0, 0)),   # context
                pl.BlockSpec((E, E), lambda i: (0, 0)),                   # Wq^T * scale
                pl.BlockSpec((E, 2 * E), lambda i: (0, 0)),               # [Wk^T | Wv^T]
                pl.BlockSpec((E, E), lambda i: (0, 0)),                   # Wo^T
                pl.BlockSpec((8, 2 * E), lambda i: (0, 0)),               # packed biases / LN params
            ],
            out_specs=pl.BlockSpec((batch_tile, Lq, E), lambda i: (i, 0, 0)),
            scratch_shapes=[pltpu.VMEM((batch_tile, Lq, E), jnp.float32)],
        ),
        compiler_params=pltpu.CompilerParams(
            dimension_semantics=("parallel",),
            vmem_limit_bytes=vmem_limit),
        cost_estimate=cost,
    )(query, context, wq_t, wkv_t, wo_t, pparams)


def _reference(query, context, params, num_heads, ln_eps=1e-5):
    """Pure-JAX f32 reference mirroring nn.MultiheadAttention + residual + LayerNorm."""
    B, Lq, E = query.shape
    Lk = context.shape[1]
    dh = E // num_heads
    q = query @ params["wq"].T + params["bq"]
    k = context @ params["wk"].T + params["bk"]
    v = context @ params["wv"].T + params["bv"]
    q = q.reshape(B, Lq, num_heads, dh).transpose(0, 2, 1, 3)
    k = k.reshape(B, Lk, num_heads, dh).transpose(0, 2, 1, 3)
    v = v.reshape(B, Lk, num_heads, dh).transpose(0, 2, 1, 3)
    s = jnp.einsum("bhqd,bhkd->bhqk", q, k) / math.sqrt(dh)
    p = jax.nn.softmax(s, axis=-1)
    o = jnp.einsum("bhqk,bhkd->bhqd", p, v).transpose(0, 2, 1, 3).reshape(B, Lq, E)
    o = o @ params["wo"].T + params["bo"]
    x = query + o
    mean = x.mean(-1, keepdims=True)
    var = ((x - mean) ** 2).mean(-1, keepdims=True)
    return (x - mean) / jnp.sqrt(var + ln_eps) * params["gamma"] + params["beta"]


if __name__ == "__main__":
    B, Lq, Lk, E, H = 2, 8, 8, 32, 4

    key = jax.random.PRNGKey(0)
    ks = jax.random.split(key, 12)
    w_scale = 1.0 / math.sqrt(E)
    params = {
        "wq": jax.random.normal(ks[0], (E, E), jnp.float32) * w_scale,
        "wk": jax.random.normal(ks[1], (E, E), jnp.float32) * w_scale,
        "wv": jax.random.normal(ks[2], (E, E), jnp.float32) * w_scale,
        "wo": jax.random.normal(ks[3], (E, E), jnp.float32) * w_scale,
        "bq": jax.random.normal(ks[4], (E,), jnp.float32) * 0.01,
        "bk": jax.random.normal(ks[5], (E,), jnp.float32) * 0.01,
        "bv": jax.random.normal(ks[6], (E,), jnp.float32) * 0.01,
        "bo": jax.random.normal(ks[7], (E,), jnp.float32) * 0.01,
        "gamma": jnp.ones((E,), jnp.float32),
        "beta": jnp.zeros((E,), jnp.float32),
    }

    query = jax.random.normal(ks[8], (B, Lq, E), jnp.float32)
    context = jax.random.normal(ks[9], (B, Lk, E), jnp.float32)

    ref = _reference(query, context, params, H)

    # Fast path: bf16 MXU matmuls with f32 accumulation.
    out_bf16 = cross_attention_block(query, context, params, num_heads=H,
                                     compute_dtype=jnp.bfloat16)
    out_bf16 = jax.block_until_ready(out_bf16)
    assert out_bf16.shape == (B, Lq, E)
    assert jnp.allclose(out_bf16, ref, atol=6e-2, rtol=6e-2), "bf16 kernel mismatch vs reference"

    # Full-precision path (exact reciprocal, f32 matmuls): tighter validation of the math.
    out_f32 = cross_attention_block(query, context, params, num_heads=H,
                                    compute_dtype=jnp.float32)
    out_f32 = jax.block_until_ready(out_f32)
    assert jnp.allclose(out_f32, ref, atol=2e-2, rtol=2e-2), "f32 kernel mismatch vs reference"

    print("KERNEL_OK")
</pallas_src>

<mosaic_0001>
module attributes {stable_mosaic.version = 11 : i64} {
  func.func @_cross_attn_kernel(%arg0: i32, %arg1: memref<1x8x32xf32, #tpu.memory_space<vmem>>, %arg2: memref<1x8x32xf32, #tpu.memory_space<vmem>>, %arg3: memref<32x32xbf16, #tpu.memory_space<vmem>>, %arg4: memref<32x64xbf16, #tpu.memory_space<vmem>>, %arg5: memref<32x32xbf16, #tpu.memory_space<vmem>>, %arg6: memref<8x64xf32, #tpu.memory_space<vmem>>, %arg7: memref<1x8x32xf32, #tpu.memory_space<vmem>>, %arg8: memref<1x8x32xf32, #tpu.memory_space<vmem>>) attributes {dimension_semantics = [#tpu.dimension_semantics<parallel>], iteration_bounds = array<i64: 2>, scalar_prefetch = 0 : i64, scratch_operands = 1 : i64, tpu.core_type = #tpu.core_type<tc>, window_params = [{transform_indices = @transform_0, window_bounds = array<i64: 1, 8, 32>}, {transform_indices = @transform_1, window_bounds = array<i64: 1, 8, 32>}, {pipeline_mode = #tpu.pipeline_mode<synchronous>, transform_indices = @transform_2, window_bounds = array<i64: 32, 32>}, {pipeline_mode = #tpu.pipeline_mode<synchronous>, transform_indices = @transform_3, window_bounds = array<i64: 32, 64>}, {pipeline_mode = #tpu.pipeline_mode<synchronous>, transform_indices = @transform_4, window_bounds = array<i64: 32, 32>}, {pipeline_mode = #tpu.pipeline_mode<synchronous>, transform_indices = @transform_5, window_bounds = array<i64: 8, 64>}, {transform_indices = @transform_6, window_bounds = array<i64: 1, 8, 32>}]} {
    %c0 = arith.constant 0 : index
    %c0_0 = arith.constant 0 : index
    %0 = vector.load %arg6[%c0, %c0_0] : memref<8x64xf32, #tpu.memory_space<vmem>>, vector<1x32xf32>
    %c1 = arith.constant 1 : index
    %c0_1 = arith.constant 0 : index
    %1 = vector.load %arg6[%c1, %c0_1] : memref<8x64xf32, #tpu.memory_space<vmem>>, vector<1x64xf32>
    %c2 = arith.constant 2 : index
    %c0_2 = arith.constant 0 : index
    %2 = vector.load %arg6[%c2, %c0_2] : memref<8x64xf32, #tpu.memory_space<vmem>>, vector<1x32xf32>
    %c3 = arith.constant 3 : index
    %c0_3 = arith.constant 0 : index
    %3 = vector.load %arg6[%c3, %c0_3] : memref<8x64xf32, #tpu.memory_space<vmem>>, vector<1x32xf32>
    %c4 = arith.constant 4 : index
    %c0_4 = arith.constant 0 : index
    %4 = vector.load %arg6[%c4, %c0_4] : memref<8x64xf32, #tpu.memory_space<vmem>>, vector<1x32xf32>
    %c0_5 = arith.constant 0 : index
    %c0_6 = arith.constant 0 : index
    %c0_7 = arith.constant 0 : index
    %5 = vector.load %arg1[%c0_5, %c0_6, %c0_7] : memref<1x8x32xf32, #tpu.memory_space<vmem>>, vector<1x8x32xf32>
    %6 = vector.shape_cast %5 : vector<1x8x32xf32> to vector<8x32xf32>
    %7 = arith.truncf %6 : vector<8x32xf32> to vector<8x32xbf16>
    %c0_8 = arith.constant 0 : index
    %c0_9 = arith.constant 0 : index
    %c0_10 = arith.constant 0 : index
    %8 = vector.load %arg2[%c0_8, %c0_9, %c0_10] : memref<1x8x32xf32, #tpu.memory_space<vmem>>, vector<1x8x32xf32>
    %9 = vector.shape_cast %8 : vector<1x8x32xf32> to vector<8x32xf32>
    %10 = arith.truncf %9 : vector<8x32xf32> to vector<8x32xbf16>
    %c0_11 = arith.constant 0 : index
    %c0_12 = arith.constant 0 : index
    %11 = vector.load %arg3[%c0_11, %c0_12] : memref<32x32xbf16, #tpu.memory_space<vmem>>, vector<32x32xbf16>
    %cst = arith.constant dense<0.000000e+00> : vector<8x32xf32>
    %12 = tpu.matmul %7, %11, %cst {dimension_numbers = #tpu.dot_dimension_numbers<[1], [0], [0], [1], [0, 0, 1, 1], [], []>} : vector<8x32xbf16>, vector<32x32xbf16>, vector<8x32xf32> -> vector<8x32xf32>
    %13 = vector.broadcast %0 : vector<1x32xf32> to vector<8x32xf32>
    %14 = arith.addf %12, %13 : vector<8x32xf32>
    %15 = arith.truncf %14 : vector<8x32xf32> to vector<8x32xbf16>
    %c0_13 = arith.constant 0 : index
    %c0_14 = arith.constant 0 : index
    %16 = vector.load %arg4[%c0_13, %c0_14] : memref<32x64xbf16, #tpu.memory_space<vmem>>, vector<32x64xbf16>
    %cst_15 = arith.constant dense<0.000000e+00> : vector<8x64xf32>
    %17 = tpu.matmul %10, %16, %cst_15 {dimension_numbers = #tpu.dot_dimension_numbers<[1], [0], [0], [1], [0, 0, 1, 1], [], []>} : vector<8x32xbf16>, vector<32x64xbf16>, vector<8x64xf32> -> vector<8x64xf32>
    %18 = vector.broadcast %1 : vector<1x64xf32> to vector<8x64xf32>
    %19 = arith.addf %17, %18 : vector<8x64xf32>
    %20 = arith.truncf %19 : vector<8x64xf32> to vector<8x64xbf16>
    %21 = vector.shape_cast %15 : vector<8x32xbf16> to vector<1x8x32xbf16>
    %22 = vector.shape_cast %20 : vector<8x64xbf16> to vector<1x8x64xbf16>
    %23 = vector.extract_strided_slice %21 {offsets = [0, 0, 0], sizes = [1, 8, 8], strides = [1, 1, 1]} : vector<1x8x32xbf16> to vector<1x8x8xbf16>
    %24 = vector.shape_cast %23 : vector<1x8x8xbf16> to vector<8x8xbf16>
    %25 = vector.extract_strided_slice %22 {offsets = [0, 0, 0], sizes = [1, 8, 8], strides = [1, 1, 1]} : vector<1x8x64xbf16> to vector<1x8x8xbf16>
    %26 = vector.shape_cast %25 : vector<1x8x8xbf16> to vector<8x8xbf16>
    %27 = vector.extract_strided_slice %22 {offsets = [0, 0, 32], sizes = [1, 8, 8], strides = [1, 1, 1]} : vector<1x8x64xbf16> to vector<1x8x8xbf16>
    %28 = vector.shape_cast %27 : vector<1x8x8xbf16> to vector<8x8xbf16>
    %cst_16 = arith.constant dense<0.000000e+00> : vector<8x8xf32>
    %29 = tpu.matmul %24, %26, %cst_16 {dimension_numbers = #tpu.dot_dimension_numbers<[1], [1], [0], [0], [0, 0, 1, 0], [], []>} : vector<8x8xbf16>, vector<8x8xbf16>, vector<8x8xf32> -> vector<8x8xf32>
    %cst_17 = arith.constant dense<0xFF800000> : vector<8xf32>
    %30 = vector.multi_reduction <maximumf>, %29, %cst_17 [1] : vector<8x8xf32> to vector<8xf32>
    %31 = vector.shape_cast %30 : vector<8xf32> to vector<8x1xf32>
    %32 = vector.broadcast %31 : vector<8x1xf32> to vector<8x8xf32>
    %33 = arith.subf %29, %32 : vector<8x8xf32>
    %34 = math.exp %33 : vector<8x8xf32>
    %cst_18 = arith.constant dense<0.000000e+00> : vector<8xf32>
    %35 = vector.multi_reduction <add>, %34, %cst_18 [1] : vector<8x8xf32> to vector<8xf32>
    %36 = vector.shape_cast %35 : vector<8xf32> to vector<8x1xf32>
    %37 = tpu.reciprocal %36 {approx = true} : vector<8x1xf32> -> vector<8x1xf32>
    %38 = vector.broadcast %37 : vector<8x1xf32> to vector<8x8xf32>
    %39 = arith.mulf %34, %38 : vector<8x8xf32>
    %40 = arith.truncf %39 : vector<8x8xf32> to vector<8x8xbf16>
    %cst_19 = arith.constant dense<0.000000e+00> : vector<8x8xf32>
    %41 = tpu.matmul %40, %28, %cst_19 {dimension_numbers = #tpu.dot_dimension_numbers<[1], [0], [0], [1], [0, 0, 1, 1], [], []>} : vector<8x8xbf16>, vector<8x8xbf16>, vector<8x8xf32> -> vector<8x8xf32>
    %c0_20 = arith.constant 0 : index
    %c0_21 = arith.constant 0 : index
    %c0_22 = arith.constant 0 : index
    %42 = vector.load %arg8[%c0_20, %c0_21, %c0_22] : memref<1x8x32xf32, #tpu.memory_space<vmem>>, vector<1x8x8xf32>
    %43 = vector.shape_cast %42 : vector<1x8x8xf32> to vector<8x8xf32>
    %44 = vector.shape_cast %41 : vector<8x8xf32> to vector<1x8x8xf32>
    tpu.vector_store %arg8[%c0_20, %c0_21, %c0_22], %44 {strides = array<i32>} : memref<1x8x32xf32, #tpu.memory_space<vmem>>, vector<1x8x8xf32>,
    %45 = vector.extract_strided_slice %21 {offsets = [0, 0, 8], sizes = [1, 8, 8], strides = [1, 1, 1]} : vector<1x8x32xbf16> to vector<1x8x8xbf16>
    %46 = vector.shape_cast %45 : vector<1x8x8xbf16> to vector<8x8xbf16>
    %47 = vector.extract_strided_slice %22 {offsets = [0, 0, 8], sizes = [1, 8, 8], strides = [1, 1, 1]} : vector<1x8x64xbf16> to vector<1x8x8xbf16>
    %48 = vector.shape_cast %47 : vector<1x8x8xbf16> to vector<8x8xbf16>
    %49 = vector.extract_strided_slice %22 {offsets = [0, 0, 40], sizes = [1, 8, 8], strides = [1, 1, 1]} : vector<1x8x64xbf16> to vector<1x8x8xbf16>
    %50 = vector.shape_cast %49 : vector<1x8x8xbf16> to vector<8x8xbf16>
    %cst_23 = arith.constant dense<0.000000e+00> : vector<8x8xf32>
    %51 = tpu.matmul %46, %48, %cst_23 {dimension_numbers = #tpu.dot_dimension_numbers<[1], [1], [0], [0], [0, 0, 1, 0], [], []>} : vector<8x8xbf16>, vector<8x8xbf16>, vector<8x8xf32> -> vector<8x8xf32>
    %cst_24 = arith.constant dense<0xFF800000> : vector<8xf32>
    %52 = vector.multi_reduction <maximumf>, %51, %cst_24 [1] : vector<8x8xf32> to vector<8xf32>
    %53 = vector.shape_cast %52 : vector<8xf32> to vector<8x1xf32>
    %54 = vector.broadcast %53 : vector<8x1xf32> to vector<8x8xf32>
    %55 = arith.subf %51, %54 : vector<8x8xf32>
    %56 = math.exp %55 : vector<8x8xf32>
    %cst_25 = arith.constant dense<0.000000e+00> : vector<8xf32>
    %57 = vector.multi_reduction <add>, %56, %cst_25 [1] : vector<8x8xf32> to vector<8xf32>
    %58 = vector.shape_cast %57 : vector<8xf32> to vector<8x1xf32>
    %59 = tpu.reciprocal %58 {approx = true} : vector<8x1xf32> -> vector<8x1xf32>
    %60 = vector.broadcast %59 : vector<8x1xf32> to vector<8x8xf32>
    %61 = arith.mulf %56, %60 : vector<8x8xf32>
    %62 = arith.truncf %61 : vector<8x8xf32> to vector<8x8xbf16>
    %cst_26 = arith.constant dense<0.000000e+00> : vector<8x8xf32>
    %63 = tpu.matmul %62, %50, %cst_26 {dimension_numbers = #tpu.dot_dimension_numbers<[1], [0], [0], [1], [0, 0, 1, 1], [], []>} : vector<8x8xbf16>, vector<8x8xbf16>, vector<8x8xf32> -> vector<8x8xf32>
    %c0_27 = arith.constant 0 : index
    %c0_28 = arith.constant 0 : index
    %c8 = arith.constant 8 : index
    %64 = vector.load %arg8[%c0_27, %c0_28, %c8] : memref<1x8x32xf32, #tpu.memory_space<vmem>>, vector<1x8x8xf32>
    %65 = vector.shape_cast %64 : vector<1x8x8xf32> to vector<8x8xf32>
    %66 = vector.shape_cast %63 : vector<8x8xf32> to vector<1x8x8xf32>
    tpu.vector_store %arg8[%c0_27, %c0_28, %c8], %66 {strides = array<i32>} : memref<1x8x32xf32, #tpu.memory_space<vmem>>, vector<1x8x8xf32>,
    %67 = vector.extract_strided_slice %21 {offsets = [0, 0, 16], sizes = [1, 8, 8], strides = [1, 1, 1]} : vector<1x8x32xbf16> to vector<1x8x8xbf16>
    %68 = vector.shape_cast %67 : vector<1x8x8xbf16> to vector<8x8xbf16>
    %69 = vector.extract_strided_slice %22 {offsets = [0, 0, 16], sizes = [1, 8, 8], strides = [1, 1, 1]} : vector<1x8x64xbf16> to vector<1x8x8xbf16>
    %70 = vector.shape_cast %69 : vector<1x8x8xbf16> to vector<8x8xbf16>
    %71 = vector.extract_strided_slice %22 {offsets = [0, 0, 48], sizes = [1, 8, 8], strides = [1, 1, 1]} : vector<1x8x64xbf16> to vector<1x8x8xbf16>
    %72 = vector.shape_cast %71 : vector<1x8x8xbf16> to vector<8x8xbf16>
    %cst_29 = arith.constant dense<0.000000e+00> : vector<8x8xf32>
    %73 = tpu.matmul %68, %70, %cst_29 {dimension_numbers = #tpu.dot_dimension_numbers<[1], [1], [0], [0], [0, 0, 1, 0], [], []>} : vector<8x8xbf16>, vector<8x8xbf16>, vector<8x8xf32> -> vector<8x8xf32>
    %cst_30 = arith.constant dense<0xFF800000> : vector<8xf32>
    %74 = vector.multi_reduction <maximumf>, %73, %cst_30 [1] : vector<8x8xf32> to vector<8xf32>
    %75 = vector.shape_cast %74 : vector<8xf32> to vector<8x1xf32>
    %76 = vector.broadcast %75 : vector<8x1xf32> to vector<8x8xf32>
    %77 = arith.subf %73, %76 : vector<8x8xf32>
    %78 = math.exp %77 : vector<8x8xf32>
    %cst_31 = arith.constant dense<0.000000e+00> : vector<8xf32>
    %79 = vector.multi_reduction <add>, %78, %cst_31 [1] : vector<8x8xf32> to vector<8xf32>
    %80 = vector.shape_cast %79 : vector<8xf32> to vector<8x1xf32>
    %81 = tpu.reciprocal %80 {approx = true} : vector<8x1xf32> -> vector<8x1xf32>
    %82 = vector.broadcast %81 : vector<8x1xf32> to vector<8x8xf32>
    %83 = arith.mulf %78, %82 : vector<8x8xf32>
    %84 = arith.truncf %83 : vector<8x8xf32> to vector<8x8xbf16>
    %cst_32 = arith.constant dense<0.000000e+00> : vector<8x8xf32>
    %85 = tpu.matmul %84, %72, %cst_32 {dimension_numbers = #tpu.dot_dimension_numbers<[1], [0], [0], [1], [0, 0, 1, 1], [], []>} : vector<8x8xbf16>, vector<8x8xbf16>, vector<8x8xf32> -> vector<8x8xf32>
    %c0_33 = arith.constant 0 : index
    %c0_34 = arith.constant 0 : index
    %c16 = arith.constant 16 : index
    %86 = vector.load %arg8[%c0_33, %c0_34, %c16] : memref<1x8x32xf32, #tpu.memory_space<vmem>>, vector<1x8x8xf32>
    %87 = vector.shape_cast %86 : vector<1x8x8xf32> to vector<8x8xf32>
    %88 = vector.shape_cast %85 : vector<8x8xf32> to vector<1x8x8xf32>
    tpu.vector_store %arg8[%c0_33, %c0_34, %c16], %88 {strides = array<i32>} : memref<1x8x32xf32, #tpu.memory_space<vmem>>, vector<1x8x8xf32>,
    %89 = vector.extract_strided_slice %21 {offsets = [0, 0, 24], sizes = [1, 8, 8], strides = [1, 1, 1]} : vector<1x8x32xbf16> to vector<1x8x8xbf16>
    %90 = vector.shape_cast %89 : vector<1x8x8xbf16> to vector<8x8xbf16>
    %91 = vector.extract_strided_slice %22 {offsets = [0, 0, 24], sizes = [1, 8, 8], strides = [1, 1, 1]} : vector<1x8x64xbf16> to vector<1x8x8xbf16>
    %92 = vector.shape_cast %91 : vector<1x8x8xbf16> to vector<8x8xbf16>
    %93 = vector.extract_strided_slice %22 {offsets = [0, 0, 56], sizes = [1, 8, 8], strides = [1, 1, 1]} : vector<1x8x64xbf16> to vector<1x8x8xbf16>
    %94 = vector.shape_cast %93 : vector<1x8x8xbf16> to vector<8x8xbf16>
    %cst_35 = arith.constant dense<0.000000e+00> : vector<8x8xf32>
    %95 = tpu.matmul %90, %92, %cst_35 {dimension_numbers = #tpu.dot_dimension_numbers<[1], [1], [0], [0], [0, 0, 1, 0], [], []>} : vector<8x8xbf16>, vector<8x8xbf16>, vector<8x8xf32> -> vector<8x8xf32>
    %cst_36 = arith.constant dense<0xFF800000> : vector<8xf32>
    %96 = vector.multi_reduction <maximumf>, %95, %cst_36 [1] : vector<8x8xf32> to vector<8xf32>
    %97 = vector.shape_cast %96 : vector<8xf32> to vector<8x1xf32>
    %98 = vector.broadcast %97 : vector<8x1xf32> to vector<8x8xf32>
    %99 = arith.subf %95, %98 : vector<8x8xf32>
    %100 = math.exp %99 : vector<8x8xf32>
    %cst_37 = arith.constant dense<0.000000e+00> : vector<8xf32>
    %101 = vector.multi_reduction <add>, %100, %cst_37 [1] : vector<8x8xf32> to vector<8xf32>
    %102 = vector.shape_cast %101 : vector<8xf32> to vector<8x1xf32>
    %103 = tpu.reciprocal %102 {approx = true} : vector<8x1xf32> -> vector<8x1xf32>
    %104 = vector.broadcast %103 : vector<8x1xf32> to vector<8x8xf32>
    %105 = arith.mulf %100, %104 : vector<8x8xf32>
    %106 = arith.truncf %105 : vector<8x8xf32> to vector<8x8xbf16>
    %cst_38 = arith.constant dense<0.000000e+00> : vector<8x8xf32>
    %107 = tpu.matmul %106, %94, %cst_38 {dimension_numbers = #tpu.dot_dimension_numbers<[1], [0], [0], [1], [0, 0, 1, 1], [], []>} : vector<8x8xbf16>, vector<8x8xbf16>, vector<8x8xf32> -> vector<8x8xf32>
    %c0_39 = arith.constant 0 : index
    %c0_40 = arith.constant 0 : index
    %c24 = arith.constant 24 : index
    %108 = vector.load %arg8[%c0_39, %c0_40, %c24] : memref<1x8x32xf32, #tpu.memory_space<vmem>>, vector<1x8x8xf32>
    %109 = vector.shape_cast %108 : vector<1x8x8xf32> to vector<8x8xf32>
    %110 = vector.shape_cast %107 : vector<8x8xf32> to vector<1x8x8xf32>
    tpu.vector_store %arg8[%c0_39, %c0_40, %c24], %110 {strides = array<i32>} : memref<1x8x32xf32, #tpu.memory_space<vmem>>, vector<1x8x8xf32>,
    %c0_41 = arith.constant 0 : index
    %c0_42 = arith.constant 0 : index
    %c0_43 = arith.constant 0 : index
    %111 = vector.load %arg8[%c0_41, %c0_42, %c0_43] : memref<1x8x32xf32, #tpu.memory_space<vmem>>, vector<1x8x32xf32>
    %112 = vector.shape_cast %111 : vector<1x8x32xf32> to vector<8x32xf32>
    %113 = arith.truncf %112 : vector<8x32xf32> to vector<8x32xbf16>
    %c0_44 = arith.constant 0 : index
    %c0_45 = arith.constant 0 : index
    %114 = vector.load %arg5[%c0_44, %c0_45] : memref<32x32xbf16, #tpu.memory_space<vmem>>, vector<32x32xbf16>
    %cst_46 = arith.constant dense<0.000000e+00> : vector<8x32xf32>
    %115 = tpu.matmul %113, %114, %cst_46 {dimension_numbers = #tpu.dot_dimension_numbers<[1], [0], [0], [1], [0, 0, 1, 1], [], []>} : vector<8x32xbf16>, vector<32x32xbf16>, vector<8x32xf32> -> vector<8x32xf32>
    %116 = vector.broadcast %2 : vector<1x32xf32> to vector<8x32xf32>
    %117 = arith.addf %115, %116 : vector<8x32xf32>
    %c0_47 = arith.constant 0 : index
    %c0_48 = arith.constant 0 : index
    %c0_49 = arith.constant 0 : index
    %118 = vector.load %arg1[%c0_47, %c0_48, %c0_49] : memref<1x8x32xf32, #tpu.memory_space<vmem>>, vector<1x8x32xf32>
    %119 = vector.shape_cast %118 : vector<1x8x32xf32> to vector<8x32xf32>
    %120 = arith.addf %119, %117 : vector<8x32xf32>
    %cst_50 = arith.constant dense<0.000000e+00> : vector<8xf32>
    %121 = vector.multi_reduction <add>, %120, %cst_50 [1] : vector<8x32xf32> to vector<8xf32>
    %122 = vector.shape_cast %121 : vector<8xf32> to vector<8x1xf32>
    %cst_51 = arith.constant 3.125000e-02 : f32
    %123 = vector.broadcast %cst_51 : f32 to vector<8x1xf32>
    %124 = arith.mulf %122, %123 : vector<8x1xf32>
    %125 = vector.broadcast %124 : vector<8x1xf32> to vector<8x32xf32>
    %126 = arith.subf %120, %125 : vector<8x32xf32>
    %127 = arith.mulf %126, %126 : vector<8x32xf32>
    %cst_52 = arith.constant dense<0.000000e+00> : vector<8xf32>
    %128 = vector.multi_reduction <add>, %127, %cst_52 [1] : vector<8x32xf32> to vector<8xf32>
    %129 = vector.shape_cast %128 : vector<8xf32> to vector<8x1xf32>
    %cst_53 = arith.constant 3.125000e-02 : f32
    %130 = vector.broadcast %cst_53 : f32 to vector<8x1xf32>
    %131 = arith.mulf %129, %130 : vector<8x1xf32>
    %cst_54 = arith.constant 9.99999974E-6 : f32
    %132 = vector.broadcast %cst_54 : f32 to vector<8x1xf32>
    %133 = arith.addf %131, %132 : vector<8x1xf32>
    %134 = math.rsqrt %133 : vector<8x1xf32>
    %135 = vector.broadcast %134 : vector<8x1xf32> to vector<8x32xf32>
    %136 = arith.mulf %126, %135 : vector<8x32xf32>
    %137 = vector.broadcast %3 : vector<1x32xf32> to vector<8x32xf32>
    %138 = arith.mulf %136, %137 : vector<8x32xf32>
    %139 = vector.broadcast %4 : vector<1x32xf32> to vector<8x32xf32>
    %140 = arith.addf %138, %139 : vector<8x32xf32>
    %141 = vector.shape_cast %140 : vector<8x32xf32> to vector<1x8x32xf32>
    %c0_55 = arith.constant 0 : index
    %c0_56 = arith.constant 0 : index
    %c0_57 = arith.constant 0 : index
    %142 = vector.load %arg7[%c0_55, %c0_56, %c0_57] : memref<1x8x32xf32, #tpu.memory_space<vmem>>, vector<1x8x32xf32>
    tpu.vector_store %arg7[%c0_55, %c0_56, %c0_57], %141 {strides = array<i32>} : memref<1x8x32xf32, #tpu.memory_space<vmem>>, vector<1x8x32xf32>,
    return
  }
  func.func @transform_0(%arg0: i32) -> (i32, i32, i32) {
    %c0_i32 = arith.constant 0 : i32
    %c0_i32_0 = arith.constant 0 : i32
    %c0_i32_1 = arith.constant 0 : i32
    return %arg0, %c0_i32, %c0_i32_0 : i32, i32, i32
  }
  func.func @transform_1(%arg0: i32) -> (i32, i32, i32) {
    %c0_i32 = arith.constant 0 : i32
    %c0_i32_0 = arith.constant 0 : i32
    %c0_i32_1 = arith.constant 0 : i32
    return %arg0, %c0_i32, %c0_i32_0 : i32, i32, i32
  }
  func.func @transform_2(%arg0: i32) -> (i32, i32) {
    %c0_i32 = arith.constant 0 : i32
    %c0_i32_0 = arith.constant 0 : i32
    %c0_i32_1 = arith.constant 0 : i32
    return %c0_i32, %c0_i32_0 : i32, i32
  }
  func.func @transform_3(%arg0: i32) -> (i32, i32) {
    %c0_i32 = arith.constant 0 : i32
    %c0_i32_0 = arith.constant 0 : i32
    %c0_i32_1 = arith.constant 0 : i32
    return %c0_i32, %c0_i32_0 : i32, i32
  }
  func.func @transform_4(%arg0: i32) -> (i32, i32) {
    %c0_i32 = arith.constant 0 : i32
    %c0_i32_0 = arith.constant 0 : i32
    %c0_i32_1 = arith.constant 0 : i32
    return %c0_i32, %c0_i32_0 : i32, i32
  }
  func.func @transform_5(%arg0: i32) -> (i32, i32) {
    %c0_i32 = arith.constant 0 : i32
    %c0_i32_0 = arith.constant 0 : i32
    %c0_i32_1 = arith.constant 0 : i32
    return %c0_i32, %c0_i32_0 : i32, i32
  }
  func.func @transform_6(%arg0: i32) -> (i32, i32, i32) {
    %c0_i32 = arith.constant 0 : i32
    %c0_i32_0 = arith.constant 0 : i32
    %c0_i32_1 = arith.constant 0 : i32
    return %arg0, %c0_i32, %c0_i32_0 : i32, i32, i32
  }
}

</mosaic_0001>

<bundles_post_ra>
// kernel: tpu_custom_call.1
= control target key start
LH: loop header
LB: loop body
LE: loop exit
PB: predicated region body
PF: predicated region fallthrough
CT: control target
= control target key end

     0   :  { %s1663_s0 = inlined_call_operand.hbm [shape: f32[2,8,32], index: 0, kind: input, shape index: {}]   ;;  %s1664_s1 = inlined_call_operand.hbm [shape: f32[2,8,32], index: 1, kind: input, shape index: {}]   ;;  %s1665_s2 = inlined_call_operand.hbm [shape: bf16[32,32], index: 2, kind: input, shape index: {}]   ;;  %s1666_s3 = inlined_call_operand.hbm [shape: bf16[32,64], index: 3, kind: input, shape index: {}]   ;;  %s1667_s4 = inlined_call_operand.hbm [shape: bf16[32,32], index: 4, kind: input, shape index: {}]   ;;  %s1668_s5 = inlined_call_operand.hbm [shape: f32[8,64], index: 5, kind: input, shape index: {}]   ;;  %s1669_s6 = inlined_call_operand.hbm [shape: f32[2,8,32], index: 6, kind: output, shape index: {}]  }
   0x1   :  { %1670 = sst [smem:[#allocation22_spill]] %s1665_s2 }
   0x2   :  { %1671 = sst [smem:[#allocation23_spill]] %s1666_s3 }
   0x3   :  { %1672 = sst [smem:[#allocation24_spill]] %s1667_s4 }
   0x4   :  { %1673 = sst [smem:[#allocation25_spill]] %s1668_s5 }
   0x5   :  { %11 = vsyncpa [#allocation4], 0 }
   0x6   :  { %13 = vsyncpa [#allocation4 + $0x1], 0 }
   0x7   :  { %14 = vsyncpa [#allocation7], 0 }
   0x8   :  { %16 = vsyncpa [#allocation7 + $0x1], 0 }
   0x9   :  { %17 = vsyncpa [#allocation10], 0 }
   0xa   :  { %18 = vsyncpa [#allocation13], 0 }
   0xb   :  { %19 = vsyncpa [#allocation5], 0 }
   0xc   :  { %21 = vsyncpa [#allocation5 + $0x1], 0  ;;  %s1415_s21 = smov 0   ;;  %s1417_s22 = smov 0  }
   0xd   :  { %s1419_s23 = smov 0   ;;  %s1421_s24 = smov 0  }
   0xe LB: > { %s1674_s2 = sld [smem:[#allocation22_spill]]  ;;  %s1439_s28 = sadd.s32 4294967295, %s1362_s24   ;;  %s1362_s24 = sphi %s1421_s24, %s1691_s24   ;;  %s1358_s23 = sphi %s1419_s23, %s1690_s23   ;;  %s1354_s22 = sphi %s1417_s22, %s1689_s22   ;;  %s1350_s21 = sphi %s1415_s21, %s1688_s21  }
   0xf   : > { %p910_p0 = scmp.ge.s32.totalorder %s1362_s24, 1  ;;  %p48_p1 = scmp.eq.s32.totalorder %s1439_s28, 0 }
  0x10   : > { %p194_p2 = scmp.lt.s32.totalorder %s1362_s24, 3  ;;  %s1364_s30 = smov [#allocation8]  }
  0x11   : > { %s207_s7 = sshll.u32 %s1364_s30, 4  ;;  %s1676_s3 = sld [smem:[#allocation23_spill]]  ;;  %s208_s7 = int_to_ptr.vmem [resolvable:$true] %s207_s7 }
  0x12   : > { %p1444_p3 = pnand %p910_p0, %p194_p2  ;;  %s1678_s4 = sld [smem:[#allocation24_spill]] }
  0x13   : > { %s1365_s15 = smov [#allocation9]   ;;  %s1366_s17 = smov 64  }
  0x14   : > { %s205_s27 = sshll.u32 %s1674_s2, 4  ;;  %p995_p4 = pneg %p1444_p3  ;;  %s206_s27 = int_to_ptr.hbm [resolvable:$true] %s205_s27 }
  0x15   : > { %s221_s16 = sshll.u32 %s1365_s15, 4  ;;  %s1367_s18 = smov 4   ;;  %s222_s16 = int_to_ptr.vmem [resolvable:$true] %s221_s16 }
  0x16   : > { %p1456_p6 = pnand %p995_p4, %p48_p1  ;;  %s1679_s5 = sld [smem:[#allocation25_spill]] }
  0x17   : > { %s219_s10 = sshll.u32 %s1676_s3, 4  ;;  %s1368_s26 = smov [#allocation11]   ;;  %s220_s10 = int_to_ptr.hbm [resolvable:$true] %s219_s10 }
  0x18   : > { %s233_s14 = sshll.u32 %s1678_s4, 4  ;;  %s235_s30 = sshll.u32 %s1368_s26, 4  ;;  %s234_s14 = int_to_ptr.hbm [resolvable:$true] %s233_s14  ;;  %s236_s30 = int_to_ptr.vmem [resolvable:$true] %s235_s30 }
  0x19   : > { %998 = dma.hbm_to_vmem [thread:$0]  (!%p1456_p6), %s206_s27, 256, %s208_s7, [#allocation7], %s1366_s17, %s1366_s17, %s1367_s18  }
  0x1a   : > { %1001 = dma.hbm_to_vmem [thread:$0]  (!%p1456_p6), %s220_s10, 256, %s222_s16, [#allocation10], %s1366_s17, %s1366_s17, %s1367_s18  }
  0x1b   : > { %1004 = dma.hbm_to_vmem [thread:$0]  (!%p1456_p6), %s234_s14, 256, %s236_s30, [#allocation10], %s1366_s17, %s1366_s17, %s1367_s18  }
  0x1c   : > { %s248_s25 = sshll.u32 %s1679_s5, 4  ;;  %s1369_s27 = smov [#allocation12]   ;;  %s249_s25 = int_to_ptr.hbm [resolvable:$true] %s248_s25 }
  0x1d   : > { %s250_s7 = sshll.u32 %s1369_s27, 4  ;;  %s909_s8 = sadd.s32 4294967294, %s1362_s24   ;;  %s251_s7 = int_to_ptr.vmem [resolvable:$true] %s250_s7 }
  0x1e   : > { %1007 = dma.hbm_to_vmem [thread:$0]  (!%p1456_p6), %s249_s25, 128, %s251_s7, [#allocation13]  }
  0x1f   : > { %s1476_s9 = sadd.s32 1, %s1362_s24   ;;  %s34_s12 = sadd.s32 1, %s1358_s23 }
  0x20   : > { %s31_s10 = ssub.s32 %s1362_s24, %s1476_s9  ;;  %p41_p8 = scmp.ne.s32.totalorder %s1358_s23, %s1354_s22 }
  0x21   : > { %p32_p7 = scmp.eq.s32.totalorder %s31_s10, 0  ;;  %p42_p9 = scmp.eq.s32.totalorder %s1362_s24, 0 }
  0x22   : > { %p47_p10 = scmp.ne.s32.totalorder %s1354_s22, %s1350_s21  ;;  %p181_p13 = scmp.eq.s32.totalorder %s1439_s28, 1 }
  0x23   : > { %s1487_s13 = scalar_select %p32_p7, %s1358_s23, %s34_s12  }
  0x24   : > { %p1489_p11 = por %p42_p9, %p41_p8  ;;  %p1495_p12 = por %p48_p1, %p47_p10 }
  0x25   : > { %1680 = sst [smem:[#allocation21_spill]] %s1487_s13  ;;  %p187_p0 = scmp.eq.s32.totalorder %s909_s8, 1 }
  0x26   : > { %p1023_p2 = scmp.lt.s32.totalorder %s1362_s24, 2  ;;  %s261_s15 = sand.u32 1, %s1358_s23  }
  0x27   : > { %p1502_p4 = por %p181_p13, %p41_p8  ;;  %p1506_p6 = por %p187_p0, %p47_p10 }
  0x28   : > { %s1510_s18 = sshll.u32 %s261_s15, 3  ;;  %s917_s19 = sshll.u32 %s1362_s24, 3 }
  0x29   : > { %s269_s26 = scalar_lea.hbm %s1663_s0, %s917_s19  ;;  %s265_s30 = scalar_lea.vmem [#allocation3], %s1510_s18 }
  0x2a   : > { %s273_s27 = sshll.u32 %s265_s30, 4  ;;  %s271_s7 = sshll.u32 %s269_s26, 4  ;;  %s274_s27 = int_to_ptr.vmem [resolvable:$true] %s273_s27  ;;  %s272_s7 = int_to_ptr.hbm [resolvable:$true] %s271_s7 }
  0x2b   : > { %p1519_p7 = pnand %p1023_p2, %p1489_p11  ;;  %s288_s2 = scalar_lea.hbm %s1664_s1, %s917_s19 }
  0x2c   : > { %s280_s3 = sand.u32 1, %s1362_s24   ;;  %s262_s4 = scalar_lea.sflag [#allocation4], %s261_s15 }
  0x2d   : > { %s1220_s20 = sshra.s32 %s272_s7, 4  ;;  %p1224_p9 = pneg %p1519_p7  ;;  %s1221_s20 = int_to_ptr.hbm [resolvable:$true] %s1220_s20 }
  0x2e   : > { %s1222_s25 = scalar_lea.hbm %s1221_s20, 8  ;;  %s1227_s30 = scalar_lea.hbm %s1663_s0, 16 }
  0x2f   : > { %p1223_p8 = scmp.ne.s32.totalorder %s1221_s20, %s1222_s25  ;;  %p1228_p13 = scmp.lt.s32.totalorder %s1221_s20, %s1663_s0 }
  0x30   : > { %p1229_p0 = scmp.lt.s32.totalorder %s1227_s30, %s1222_s25 }
  0x31   : > { %p1225_p10 = pnand %p1224_p9, %p1223_p8 }
  0x32   : > { %p1230_p2 = por %p1229_p0, %p1228_p13 }
  0x33   : > { %p1226_p11 = pneg %p1225_p10 }
  0x35   : > { %p1231_p5 = pnand %p1230_p2, %p1226_p11 }
  0x37   : > { %1234 = shalt.err (!%p1231_p5)
}
  0x38   : > { %1011 = dma.hbm_to_vmem [thread:$0]  (!%p1519_p7), %s272_s7, 128, %s274_s27, %s262_s4  }
  0x39   : > { %s290_s15 = sshll.u32 %s288_s2, 4  ;;  %s284_s19 = scalar_lea.vmem [#allocation6], %s1510_s18  ;;  %s291_s15 = int_to_ptr.hbm [resolvable:$true] %s290_s15 }
  0x3a   : > { %s292_s5 = sshll.u32 %s284_s19, 4  ;;  %s281_s14 = scalar_lea.sflag [#allocation7], %s280_s3  ;;  %s293_s5 = int_to_ptr.vmem [resolvable:$true] %s292_s5 }
  0x3b   : > { %s1250_s26 = sshra.s32 %s291_s15, 4  ;;  %s1257_s30 = scalar_lea.hbm %s1664_s1, 16  ;;  %s1251_s26 = int_to_ptr.hbm [resolvable:$true] %s1250_s26 }
  0x3c   : > { %s1252_s13 = scalar_lea.hbm %s1251_s26, 8  ;;  %p1258_p5 = scmp.lt.s32.totalorder %s1251_s26, %s1664_s1 }
  0x3d   : > { %p1253_p8 = scmp.ne.s32.totalorder %s1251_s26, %s1252_s13  ;;  %p1259_p13 = scmp.lt.s32.totalorder %s1257_s30, %s1252_s13 }
  0x3f   : > { %p1255_p10 = pnand %p1253_p8, %p1224_p9  ;;  %p1260_p0 = por %p1259_p13, %p1258_p5 }
  0x41   : > { %p1256_p11 = pneg %p1255_p10 }
  0x43   : > { %p1261_p2 = pnand %p1260_p0, %p1256_p11 }
  0x45   : > { %1264 = shalt.err (!%p1261_p2)
}
  0x46   : > { %1014 = dma.hbm_to_vmem [thread:$0]  (!%p1519_p7), %s291_s15, 128, %s293_s5, %s281_s14  }
  0x47   : > { %301 = sbr.rel (%p1444_p3) target bundleno = 1685 (0x695), region = 44  ;;  %s1555_s2 = sand.u32 (!%p1444_p3), 1, %s1354_s22  }
  0x48   : > { %s1558_s3 = sshll.u32 (!%p1444_p3), %s1555_s2, 3  ;;  %s304_s18 = scalar_lea.sflag (!%p1444_p3), [#allocation4], %s1555_s2 }
  0x49   : > { %s307_s13 = scalar_lea.vmem (!%p1444_p3), [#allocation3], %s1558_s3 }
  0x4c   : > { %1325 = dma.done.wait (%p1495_p12), %s304_s18, 128  }
  0x4d   : > { %1327 = vsyncadd (%p1495_p12), %s304_s18, 4294967168  ;;  %s313_s5 = sand.u32 1, %s1439_s28   ;;  %s317_s27 = scalar_lea.vmem [#allocation6], %s1558_s3 }
  0x4e   : > { %s314_s29 = scalar_lea.sflag [#allocation7], %s313_s5 }
  0x4f   : > { %1329 = dma.done.wait (%p1495_p12), %s314_s29, 128  }
  0x50   : > { %1331 = vsyncadd (%p1495_p12), %s314_s29, 4294967168 }
  0x51   : > { %1333 = dma.done.wait (%p48_p1), [#allocation7], 256  }
  0x52   : > { %1335 = vsyncadd (%p48_p1), [#allocation7], 4294967040 }
  0x53   : > { %1337 = dma.done.wait (%p48_p1), [#allocation10], 512  }
  0x54   : > { %1339 = vsyncadd (%p48_p1), [#allocation10], 4294966784 }
  0x55   : > { %1341 = dma.done.wait (%p48_p1), [#allocation13], 128  }
  0x56   : > { %1343 = vsyncadd (%p48_p1), [#allocation13], 4294967168  ;;  %v968_v0 = vld [vmem:[#allocation8 + $0x8] sm:$0xff]  ;;  %v970_v1 = vld [vmem:[#allocation9 + $0x8] sm:$0xff]  ;;  %vm399_vm0 = vcmask 261120   ;;  %vm451_vm1 = vcmask 64512  }
  0x57   : > { %v967_v2 = vld [vmem:[#allocation8] sm:$0xff]  ;;  %v969_v3 = vld [vmem:[#allocation9] sm:$0xff]  ;;  %409 = vmatpush.bf16.msra.mxu0 %v968_v0  ;;  %443 = vmatpush.bf16.msra.mxu1 %v970_v1  ;;  %s1370_s11 = smov 96   ;;  %s1371_s7 = smov 120   ;;  %vm491_vm2 = vcmask 1043456   ;;  %vm572_vm3 = vcmask 130112  }
  0x58   : > { %v1584_v4 = vld [vmem:[%s307_s13] sm:$0xff]  ;;  %v380_v5 = vld [vmem:[%s317_s27] sm:$0xff]  ;;  %s1372_s8 = smov 112   ;;  %s1373_s12 = smov 104   ;;  %vm634_vm4 = vcmask 195712   ;;  %vm696_vm5 = vcmask 261312  }
  0x59   : > { %v379_v6 = vpack.c.bf16 %v1584_v4, %v1584_v4  ;;  %v381_v7 = vpack.c.bf16 %v380_v5, %v380_v5  ;;  %v1077_v8 = vld [vmem:[#allocation12] ss:$0 sm:$0xff]  ;;  %v1078_v9 = vld [vmem:[#allocation12 + $0x1] ss:$0 sm:$0xff]  ;;  %s1374_s15 = smov 88   ;;  %s1375_s19 = smov 80  }
  0x5a   : > { %s1376_s14 = smov 72   ;;  %s1377_s26 = smov 8  }
  0x5b   : > { %410 = vmatpush.bf16.msra.mxu0 %v967_v2  ;;  %444 = vmatpush.bf16.msra.mxu1 %v969_v3  ;;  %s1378_s20 = smov 16   ;;  %s1379_s25 = smov 24  }
  0x5c   : > { %s964_s30 = sshll.u32 %s1439_s28, 3  ;;  %s371_s13 = scalar_lea.vmem [#allocation14], %s1558_s3 }
  0x5d   : > { %s773_s18 = scalar_lea.hbm %s1669_s6, %s964_s30  ;;  %s775_s5 = sshll.u32 %s371_s13, 4  ;;  %s776_s5 = int_to_ptr.vmem [resolvable:$true] %s775_s5 }
  0x5e   : > { %936 = vmatmul.msk.bf16.vlgmr.msra.gmra.mxu0 %vm399_vm0, %v379_v6  ;;  %945 = vmatmul.msk.bf16.vlgmr.msra.gmra.mxu1 %vm399_vm0, %v381_v7  ;;  %s777_s29 = sshll.u32 %s773_s18, 4  ;;  %s763_s28 = scalar_lea.sflag [#allocation5], %s1555_s2  ;;  %s778_s29 = int_to_ptr.hbm [resolvable:$true] %s777_s29 }
  0x5f   : > { %s1294_s27 = sshra.s32 %s778_s29, 4  ;;  %s1300_s3 = scalar_lea.hbm %s1669_s6, 16  ;;  %s1295_s27 = int_to_ptr.hbm [resolvable:$true] %s1294_s27 }
  0x60   : > { %p1301_p7 = scmp.lt.s32.totalorder %s1295_s27, %s1669_s6 }
  0xdb   : > { %v412_v10 = vpop.f32.mrf.mxu0  ;;  %v446_v11 = vpop.f32.mrf.mxu1 }
  0xdc   : > { %v413_v12 = vadd.f32 %v1077_v8, %v412_v10  ;;  %v447_v13 = vadd.f32 %v1078_v9, %v446_v11 }
  0xde   : > { %v416_v14 = vpack.c.bf16 %v413_v12, %v413_v12  ;;  %v450_v15 = vpack.c.bf16 %v447_v13, %v447_v13 }
  0xe0   : > { %v510_v16 = vunpack.c.l.b16 %v416_v14  ;;  %v484_v17 = vunpack.c.l.b16 %v450_v15  ;;  %v456_v18 = vsel %vm451_vm1, %v450_v15, 0 }
  0xe1   : > { %465 = vmatpush.bf16.xpose.msra.mxu2 %v456_v18 }
  0xe2   : > { %v511_v19 = vpack.c.b16 %v510_v16, %v510_v16  ;;  %v1591_v20 = vpack.c.b16 %v484_v17, %v484_v17 }
  0xe3   : > { %v414_v21 = vpop.f32.mrf.mxu0  ;;  %v448_v22 = vpop.f32.mrf.mxu1 }
  0xe4   : > { %486 = vrot.lane.b32.xlu1 %v1591_v20, %s1370_s11  ;;  %512 = vrot.lane.b32.xlu2 %v511_v19, %s1371_s7  ;;  %s1296_s11 = scalar_lea.hbm %s1295_s27, 8 }
  0xe5   : > { %p1297_p1 = scmp.ne.s32.totalorder %s1295_s27, %s1296_s11  ;;  %p1302_p9 = scmp.lt.s32.totalorder %s1300_s3, %s1296_s11 }
  0xe7   : > { %p1298_p3 = pnand %p1297_p1, %p1502_p4  ;;  %p1303_p8 = por %p1302_p9, %p1301_p7 }
  0xe8   : > { %946 = vmatmul.msk.bf16.vlgmr.msra.gmra.mxu2 %vm451_vm1, %v416_v14 }
  0xe9   : > { %p1299_p12 = pneg %p1298_p3 }
  0xeb   : > { %p1304_p10 = pnand %p1303_p8, %p1299_p12 }
  0xec   : > { %514 = vrot.lane.b32.xlu1 %v1591_v20, %s1371_s7  ;;  %576 = vrot.lane.b32.xlu2 %v1591_v20, %s1372_s8 }
  0xf4   : > { %574 = vrot.lane.b32.xlu1 %v511_v19, %s1372_s8  ;;  %636 = vrot.lane.b32.xlu2 %v511_v19, %s1373_s12 }
 0x13e   : > { %v513_v23 = vpop.permute.xlu2 %512 }
 0x146   : > { %v577_v24 = vpop.permute.xlu2 %576 }
 0x147   : > { %v582_v25 = vsel %vm451_vm1, %v577_v24, 0 }
 0x148   : > { %591 = vmatpush.bf16.xpose.msrb.mxu1 %v582_v25 }
 0x14e   : > { %v637_v42 = vpop.permute.xlu2 %636 }
 0x156   : > { %v487_v26 = vpop.permute.xlu1 %486 }
 0x157   : > { %v493_v27 = vsel %vm491_vm2, %v487_v26, 0 }
 0x158   : > { %502 = vmatpush.bf16.msra.mxu3 %v493_v27 }
 0x15e   : > { %v515_v28 = vpop.permute.xlu1 %514 }
 0x15f   : > { %v520_v29 = vsel %vm451_vm1, %v515_v28, 0 }
 0x160   : > { %529 = vmatpush.bf16.xpose.msrb.mxu3 %v520_v29 }
 0x166   : > { %v575_v30 = vpop.permute.xlu1 %574 }
 0x167   : > { %950 = vmatmul.msk.bf16.vlgmr.msrb.gmra.mxu1 %vm451_vm1, %v575_v30 }
 0x16b   : > { %v467_v31 = vpop.f32.mrf.mxu2 }
 0x16c   : > { %v471_v32 = vsel %vm451_vm1, %v467_v31, -inf }
 0x16d   : > { %472 = vmax.xlane.f32.xlu0 %v471_v32 }
 0x173   : > { %v469_v33 = vpop.f32.mrf.mxu2 }
 0x174   : > { %v972_v33 = vld [vmem:[#allocation11 + $0x8] sm:$0xff] }
 0x175   : > { %726 = vmatpush.bf16.msra.mxu1 %v972_v33 }
 0x1e0   : > { %v473_v34 = vpop.xlane.xlu0 %472 }
 0x1e1   : > { %v474_v35 = vsub.f32 %v467_v31, %v473_v34  ;;  %v971_v34 = vld [vmem:[#allocation11] sm:$0xff] }
 0x1e2   : > { %727 = vmatpush.bf16.msra.mxu1 %v971_v34 }
 0x1e3   : > { %v475_v36 = vmul.f32 1.442695, %v474_v35 }
 0x1e4   : > { %v593_v37 = vpop.f32.mrf.mxu1 }
 0x1e5   : > { %1082 = vpow2.f32 %v475_v36  ;;  %v597_v38 = vsel %vm451_vm1, %v593_v37, -inf }
 0x1e6   : > { %598 = vmax.xlane.f32.xlu2 %v597_v38 }
 0x1eb   : > { %v1083_v39 = vpop.eup %1082 }
 0x1ec   : > { %v595_v40 = vpop.f32.mrf.mxu1  ;;  %v477_v41 = vsel %vm451_vm1, %v1083_v39, 0.0 }
 0x1ed   : > { %478 = vadd.xlane.f32.xlu0 %v477_v41  ;;  %v1079_v40 = vld [vmem:[#allocation12 + $0x2] ss:$0 sm:$0xff] }
 0x201   : > { %638 = vrot.lane.b32.xlu0 %v1591_v20, %s1373_s12 }
 0x259   : > { %v599_v43 = vpop.xlane.xlu2 %598 }
 0x25a   : > { %v600_v44 = vsub.f32 %v593_v37, %v599_v43 }
 0x25c   : > { %v601_v45 = vmul.f32 1.442695, %v600_v44 }
 0x25e   : > { %1084 = vpow2.f32 %v601_v45 }
 0x260   : > { %v479_v46 = vpop.xlane.xlu0 %478 }
 0x261   : > { %1086 = vrcp.f32 %v479_v46 }
 0x264   : > { %v1085_v47 = vpop.eup %1084 }
 0x265   : > { %v603_v48 = vsel %vm451_vm1, %v1085_v47, 0.0 }
 0x266   : > { %604 = vadd.xlane.f32.xlu2 %v603_v48 }
 0x267   : > { %v1087_v49 = vpop.eup %1086 }
 0x268   : > { %v481_v50 = vmul.f32 %v1087_v49, %v1083_v39 }
 0x26a   : > { %v482_v51 = vpack.c.bf16 %v481_v50, %v481_v50 }
 0x26c   : > { %947 = vmatmul.msk.bf16.vlgmr.msra.gmra.mxu3 %vm451_vm1, %v482_v51 }
 0x273   : > { %v639_v52 = vpop.permute.xlu0 %638 }
 0x274   : > { %v644_v53 = vsel %vm451_vm1, %v639_v52, 0 }
 0x275   : > { %653 = vmatpush.bf16.xpose.msra.mxu3 %v644_v53 }
 0x27c   : > { %948 = vmatmul.msk.bf16.vlgmr.msrb.gmra.mxu3 %vm451_vm1, %v513_v23 }
 0x28c   : > { %952 = vmatmul.msk.bf16.vlgmr.msra.gmra.mxu3 %vm451_vm1, %v637_v42 }
 0x2d9   : > { %v605_v11 = vpop.xlane.xlu2 %604 }
 0x2ef   : > { %v504_v54 = vpop.f32.mrf.mxu3 }
 0x2f0   : > { %508 = vst.msk [vmem:[#allocation2] sm:$0xff] %vm451_vm1, %v504_v54 }
 0x2f7   : > { %v506_v55 = vpop.f32.mrf.mxu3 }
 0x2ff   : > { %v531_v56 = vpop.f32.mrf.mxu3 }
 0x300   : > { %v535_v57 = vsel %vm451_vm1, %v531_v56, -inf }
 0x301   : > { %536 = vmax.xlane.f32.xlu1 %v535_v57 }
 0x307   : > { %v533_v58 = vpop.f32.mrf.mxu3 }
 0x30f   : > { %v655_v59 = vpop.f32.mrf.mxu3 }
 0x310   : > { %v659_v60 = vsel %vm451_vm1, %v655_v59, -inf }
 0x311   : > { %660 = vmax.xlane.f32.xlu0 %v659_v60 }
 0x317   : > { %v657_v61 = vpop.f32.mrf.mxu3 }
 0x318   : > { %v1081_v61 = vld [vmem:[#allocation12 + $0x4] ss:$0 sm:$0xff] }
 0x31a   : > { %547 = vrot.lane.b32.xlu1 %v1591_v20, %s1374_s15 }
 0x374   : > { %v537_v62 = vpop.xlane.xlu1 %536 }
 0x375   : > { %v538_v63 = vsub.f32 %v531_v56, %v537_v62 }
 0x377   : > { %v539_v0 = vmul.f32 1.442695, %v538_v63 }
 0x379   : > { %1088 = vpow2.f32 %v539_v0 }
 0x37f   : > { %v1089_v1 = vpop.eup %1088 }
 0x380   : > { %v541_v2 = vsel %vm451_vm1, %v1089_v1, 0.0 }
 0x381   : > { %542 = vadd.xlane.f32.xlu2 %v541_v2 }
 0x384   : > { %v661_v3 = vpop.xlane.xlu0 %660 }
 0x385   : > { %v662_v5 = vsub.f32 %v655_v59, %v661_v3  ;;  %v1080_v59 = vld [vmem:[#allocation12 + $0x3] ss:$0 sm:$0xff] }
 0x387   : > { %v663_v6 = vmul.f32 1.442695, %v662_v5 }
 0x389   : > { %1090 = vpow2.f32 %v663_v6 }
 0x38a   : > { %1092 = vrcp.f32 %v605_v11 }
 0x38c   : > { %v548_v7 = vpop.permute.xlu1 %547 }
 0x38d   : > { %v553_v8 = vsel %vm491_vm2, %v548_v7, 0 }
 0x38e   : > { %562 = vmatpush.bf16.msrb.mxu0 %v553_v8 }
 0x38f   : > { %v1091_v9 = vpop.eup %1090 }
 0x390   : > { %v665_v10 = vsel %vm451_vm1, %v1091_v9, 0.0  ;;  %v1093_v13 = vpop.eup %1092 }
 0x391   : > { %666 = vadd.xlane.f32.xlu0 %v665_v10  ;;  %v607_v15 = vmul.f32 %v1093_v13, %v1085_v47 }
 0x393   : > { %v608_v21 = vpack.c.bf16 %v607_v15, %v607_v15 }
 0x399   : > { %609 = vrot.lane.b32.xlu2 %v1591_v20, %s1375_s19 }
 0x3a5   : > { %671 = vrot.lane.b32.xlu0 %v1591_v20, %s1376_s14 }
 0x3f4   : > { %v543_v12 = vpop.xlane.xlu2 %542 }
 0x3f5   : > { %1094 = vrcp.f32 %v543_v12 }
 0x3fb   : > { %v1095_v14 = vpop.eup %1094 }
 0x3fc   : > { %v545_v16 = vmul.f32 %v1095_v14, %v1089_v1  ;;  %v610_v17 = vpop.permute.xlu2 %609 }
 0x3fd   : > { %v615_v18 = vsel %vm491_vm2, %v610_v17, 0 }
 0x3fe   : > { %624 = vmatpush.bf16.msrb.mxu2 %v615_v18  ;;  %v546_v19 = vpack.c.bf16 %v545_v16, %v545_v16 }
 0x400   : > { %949 = vmatmul.msk.bf16.vlgmr.msrb.gmra.mxu0 %vm451_vm1, %v546_v19 }
 0x401   : > { %951 = vmatmul.msk.bf16.vlgmr.msrb.gmra.mxu2 %vm451_vm1, %v608_v21 }
 0x404   : > { %v667_v22 = vpop.xlane.xlu0 %666 }
 0x405   : > { %1096 = vrcp.f32 %v667_v22 }
 0x40b   : > { %v1097_v20 = vpop.eup %1096 }
 0x40c   : > { %v669_v23 = vmul.f32 %v1097_v20, %v1091_v9 }
 0x40e   : > { %v670_v26 = vpack.c.bf16 %v669_v23, %v669_v23 }
 0x417   : > { %v672_v24 = vpop.permute.xlu0 %671 }
 0x418   : > { %v677_v25 = vsel %vm491_vm2, %v672_v24, 0 }
 0x419   : > { %686 = vmatpush.bf16.msra.mxu0 %v677_v25 }
 0x41c   : > { %953 = vmatmul.msk.bf16.vlgmr.msra.gmra.mxu0 %vm451_vm1, %v670_v26 }
 0x47d   : > { %v564_v27 = vpop.f32.mrf.mxu0 }
 0x47e   : > { %569 = vrot.lane.b32.xlu1 %v564_v27, %s1377_s26 }
 0x484   : > { %v626_v28 = vpop.f32.mrf.mxu2 }
 0x485   : > { %v566_v29 = vpop.f32.mrf.mxu0 }
 0x486   : > { %631 = vrot.lane.b32.xlu1 %v626_v28, %s1378_s20 }
 0x48c   : > { %v628_v30 = vpop.f32.mrf.mxu2 }
 0x499   : > { %v688_v31 = vpop.f32.mrf.mxu0 }
 0x49a   : > { %693 = vrot.lane.b32.xlu2 %v688_v31, %s1379_s25 }
 0x4a1   : > { %v690_v32 = vpop.f32.mrf.mxu0 }
 0x4f0   : > { %v570_v35 = vpop.permute.xlu1 %569 }
 0x4f1   : > { %573 = vst.msk [vmem:[#allocation2] sm:$0xff] %vm572_vm3, %v570_v35 }
 0x4f4   : > { %v694_v37 = vpop.permute.xlu2 %693 }
 0x4f8   : > { %v632_v36 = vpop.permute.xlu1 %631 }
 0x4f9   : > { %635 = vst.msk [vmem:[#allocation2] sm:$0xff] %vm634_vm4, %v632_v36 }
 0x4fa   : > { %697 = vst.msk [vmem:[#allocation2] sm:$0xff] %vm696_vm5, %v694_v37 }
 0x501   : > { %v698_v38 = vld [vmem:[#allocation2] sm:$0xff] }
 0x502   : > { %v699_v39 = vpack.c.bf16 %v698_v38, %v698_v38 }
 0x504   : > { %962 = vmatmul.msk.bf16.vlgmr.msra.gmra.mxu1 %vm399_vm0, %v699_v39 }
 0x581   : > { %v729_v41 = vpop.f32.mrf.mxu1 }
 0x582   : > { %v730_v42 = vadd.f32 %v1079_v40, %v729_v41 }
 0x584   : > { %v734_v43 = vadd.f32 %v730_v42, %v1584_v4 }
 0x586   : > { %v735_v44 = vsel %vm399_vm0, %v734_v43, 0.0 }
 0x587   : > { %736 = vadd.xlane.f32.xlu0 %v735_v44 }
 0x589   : > { %v731_v45 = vpop.f32.mrf.mxu1 }
 0x5fa   : > { %v737_v46 = vpop.xlane.xlu0 %736 }
 0x5fb   : > { %v738_v47 = vmul.f32 0.03125, %v737_v46 }
 0x5fd   : > { %v739_v48 = vsub.f32 %v734_v43, %v738_v47 }
 0x5ff   : > { %v740_v49 = vmul.f32 %v739_v48, %v739_v48 }
 0x601   : > { %v741_v50 = vsel %vm399_vm0, %v740_v49, 0.0 }
 0x602   : > { %742 = vadd.xlane.f32.xlu1 %v741_v50 }
 0x675   : > { %v743_v51 = vpop.xlane.xlu1 %742 }
 0x676   : > { %v744_v52 = vmul.f32 0.03125, %v743_v51 }
 0x678   : > { %v745_v53 = vadd.f32 1e-05, %v744_v52 }
 0x67a   : > { %1098 = vrsqrt.f32 %v745_v53  ;;  %vm752_vm7 = vweird.f32 %v745_v53 }
 0x680   : > { %v1099_v54 = vpop.eup %1098 }
 0x681   : > { %v747_v55 = vmul.f32 %v1099_v54, %v745_v53  ;;  %vm753_vm6 = vweird.f32 %v1099_v54 }
 0x682   : > { %vm754_vm8 = vmor %vm752_vm7, %vm753_vm6 }
 0x683   : > { %v748_v4 = vmul.f32 %v1099_v54, %v747_v55 }
 0x685   : > { %v749_v56 = vmul.f32 0.5, %v748_v4 }
 0x687   : > { %v750_v57 = vsub.f32 1.5, %v749_v56 }
 0x689   : > { %v751_v58 = vmul.f32 %v1099_v54, %v750_v57 }
 0x68b   : > { %v755_v60 = vsel %vm754_vm8, %v1099_v54, %v751_v58 }
 0x68c   : > { %v756_v62 = vmul.f32 %v755_v60, %v739_v48 }
 0x68e   : > { %v758_v63 = vmul.f32 %v1080_v59, %v756_v62 }
 0x690   : > { %v760_v0 = vadd.f32 %v1081_v61, %v758_v63 }
 0x692   : > { %761 = vst.msk [vmem:[%s371_s13] sm:$0xff] %vm399_vm0, %v760_v0 }
 0x693   : > { %1307 = shalt.err (!%p1304_p10)
}
 0x694   : > { %993 = dma.vmem_to_hbm [thread:$0]  (%p1502_p4), %s776_s5, 128, %s778_s29, %s763_s28  }
 0x695 PF: > { %s789_s2 = sand.u32 1, %s1350_s21   ;;  %p1686_p11 = scmp.ge.s32.totalorder %s1362_s24, 2 }
 0x696   : > { %s790_s19 = scalar_lea.sflag [#allocation5], %s789_s2 }
 0x697   : > { %p1016_p5 = pnand %p1686_p11, %p1506_p6 }
 0x699   : > { %p1017_p13 = pneg %p1016_p5 }
 0x69b   : > { %1345 = dma.done.wait (%p1017_p13), %s790_s19, 128  }
 0x69c   : > { %1347 = vsyncadd (%p1017_p13), %s790_s19, 4294967168  ;;  %s1687_s14 = sld [smem:[#allocation21_spill]]  ;;  %p24_p0 = scmp.ge.s32.totalorder %s1476_s9, 4  }
 0x69d   : > { %s1688_s21 = smov %s1354_s22  ;;  %s1689_s22 = smov %s1358_s23 }
 0x69e   : > { %s1691_s24 = smov %s1476_s9  ;;  %26 = sbr.rel (!%p24_p0) target bundleno = 14 (0xe), region = 118 }
 0x6a2   : > { %s1690_s23 = smov %s1687_s14 }
 0x6a3   :  { %796 = vsyncpa [#allocation4], 1 }
 0x6a4   :  { %798 = vsyncpa [#allocation4 + $0x1], 1 }
 0x6a5   :  { %799 = vsyncpa [#allocation7], 1 }
 0x6a6   :  { %801 = vsyncpa [#allocation7 + $0x1], 1 }
 0x6a7   :  { %802 = vsyncpa [#allocation10], 1 }
 0x6a8   :  { %803 = vsyncpa [#allocation13], 1 }
 0x6a9   :  { %804 = vsyncpa [#allocation5], 1 }
 0x6aa   :  { %806 = vsyncpa [#allocation5 + $0x1], 1 }

</bundles_post_ra>
